<compile_context>
chip_gen: v7x
topology: tpu7x:2x2x1
jax: 0.10.0
libtpu: 0.0.40
codegen_flags: <defaults>
</compile_context>

<pallas_src>
import functools

import jax
import jax.numpy as jnp
from jax.experimental import pallas as pl
from jax.experimental.pallas import tpu as pltpu

# ---------------- model config (synthetic, deterministic) -------------------
ncDir, ncTmp = 4, 4
numDir, numTmp = 8, 6
ncMiddle = 16
B, C, H, W = 2, 12, 16, 16          # C >= ncDir + ncTmp, extra channels pass through
HW = H * W
NC_SLAB = ncDir + ncTmp             # 8 channels used by the lighting branch
NUM_SMALL = numDir + numTmp         # 14 columns of the small-output slab

# ---------------- packed-weight slab layout: (88, 32) f32, ~11 KiB ----------
_W1_R0, _W1_R1 = 0, NC_SLAB                            # (8, 32)  blockdiag(wd1.T, wt1.T)
_W2_R0, _W2_R1 = _W1_R1, _W1_R1 + 2 * ncMiddle          # (32, 14) blockdiag(wd2.T, wt2.T)
_WP1_R0, _WP1_R1 = _W2_R1, _W2_R1 + NUM_SMALL           # (14, 32) blockdiag(wpd1.T, wpt1.T)
_A1_R = _WP1_R1                                         # row 54: stage-1 PReLU alphas (32)
_A2_R = _A1_R + 1                                       # row 55: post PReLU alphas (32)
_WP2_R0 = ((_A2_R + 1 + 7) // 8) * 8                    # 56 (sublane-aligned, no gap here)
_WP2_R1 = _WP2_R0 + 2 * ncMiddle                        # 88, (32, 8) blockdiag(wpd2.T, wpt2.T)
SLAB_ROWS, SLAB_COLS = _WP2_R1, 2 * ncMiddle            # (88, 32)


# ---------------- fused kernel (one grid step = one batch row) --------------
def _fused_kernel(inner_ref, guide_ref, w_ref, out_ref, packed_ref):
    _, nc, hw = inner_ref.shape                              # (1, NC_SLAB, hw)

    # spatial means over H*W for the 8 lighting channels (inner & guide)
    feat_i = jnp.mean(inner_ref[...], axis=-1)               # (1, 8)
    feat_g = jnp.mean(guide_ref[...], axis=-1)               # (1, 8)
    x0 = jnp.concatenate([feat_i, feat_g], axis=0)           # (2, 8)

    # pre-transposed, block-diagonalized weights + alphas (static ref slices)
    W1 = w_ref[_W1_R0:_W1_R1, :]                             # (8, 32)
    W2 = w_ref[_W2_R0:_W2_R1, 0:NUM_SMALL]                   # (32, 14)
    Wp1 = w_ref[_WP1_R0:_WP1_R1, :]                          # (14, 32)
    a1 = w_ref[_A1_R:_A1_R + 1, :]                           # (1, 32)
    a2 = w_ref[_A2_R:_A2_R + 1, :]                           # (1, 32)
    Wp2 = w_ref[_WP2_R0:_WP2_R1, 0:NC_SLAB]                  # (32, 8)

    # predict stage: dir ⊕ tmp block-diagonal, inner & guide rows stacked
    h1 = jnp.dot(x0, W1, preferred_element_type=jnp.float32)          # (2, 32)
    h1 = jnp.where(h1 >= 0, h1, a1 * h1)                              # PReLU
    y = jnp.dot(h1, W2, preferred_element_type=jnp.float32)           # (2, 14)

    # post stage on the guide row: [glight | gtmp]
    yg = y[1:2, :]                                                    # (1, 14)
    h2 = jnp.dot(yg, Wp1, preferred_element_type=jnp.float32)         # (1, 32)
    h2 = jnp.where(h2 >= 0, h2, a2 * h2)
    up = jnp.maximum(jnp.dot(h2, Wp2, preferred_element_type=jnp.float32), 0.0)  # (1, 8)

    # small outputs: raw y slab; light/glight/tmp/gtmp sliced in the wrapper
    packed_ref[...] = y.reshape(1, 2, NUM_SMALL)

    # aliased write-back: only the 8 replaced channels, one broadcast store
    out_ref[...] = jnp.broadcast_to(up[:, :, None], (1, nc, hw))


# ---------------- host-side weight packing (done once) ----------------------
def pack_params(p):
    wd1, wd2 = p["wd1"], p["wd2"]
    wt1, wt2 = p["wt1"], p["wt2"]
    wpd1, wpd2 = p["wpd1"], p["wpd2"]
    wpt1, wpt2 = p["wpt1"], p["wpt2"]
    a_d, a_t, a_pd, a_pt = p["prelu"]

    def z(r, c):
        return jnp.zeros((r, c), jnp.float32)

    W1 = jnp.block([[wd1.T, z(ncDir, ncMiddle)],
                    [z(ncTmp, ncMiddle), wt1.T]])               # (8, 32)
    W2 = jnp.block([[wd2.T, z(ncMiddle, numTmp)],
                    [z(ncMiddle, numDir), wt2.T]])              # (32, 14)
    Wp1 = jnp.block([[wpd1.T, z(numDir, ncMiddle)],
                     [z(numTmp, ncMiddle), wpt1.T]])            # (14, 32)
    Wp2 = jnp.block([[wpd2.T, z(ncMiddle, ncTmp)],
                     [z(ncMiddle, ncDir), wpt2.T]])             # (32, 8)
    alpha1 = jnp.concatenate([jnp.full((ncMiddle,), a_d, jnp.float32),
                              jnp.full((ncMiddle,), a_t, jnp.float32)])
    alpha2 = jnp.concatenate([jnp.full((ncMiddle,), a_pd, jnp.float32),
                              jnp.full((ncMiddle,), a_pt, jnp.float32)])

    slab = jnp.zeros((SLAB_ROWS, SLAB_COLS), jnp.float32)
    slab = slab.at[_W1_R0:_W1_R1, :].set(W1)
    slab = slab.at[_W2_R0:_W2_R1, 0:NUM_SMALL].set(W2)
    slab = slab.at[_WP1_R0:_WP1_R1, :].set(Wp1)
    slab = slab.at[_A1_R, :].set(alpha1)
    slab = slab.at[_A2_R, :].set(alpha2)
    slab = slab.at[_WP2_R0:_WP2_R1, 0:NC_SLAB].set(Wp2)
    return slab


# ---------------- wrapper ----------------------------------------------------
@functools.partial(jax.jit, donate_argnums=(0,))
def lighting_net_forward(innerFeat, guide_feat, w_slab):
    """innerFeat, guide_feat: (B, C, H, W) f32. innerFeat is donated (written in place).
    Returns the same tuple as the torch module."""
    b, c, row, col = innerFeat.shape
    hw = row * col
    inner_flat = innerFeat.reshape(b, c, hw)       # free metadata reshape
    guide_flat = guide_feat.reshape(b, c, hw)

    # TODO(synk): for large H*W, split the spatial reduction from the
    # writeback with a trailing "arbitrary" HW-tile axis (tiles >= 512 lanes)
    # and/or raise vmem_limit_bytes; per-block VMEM here is only a few KiB.
    out_flat, packed = pl.pallas_call(
        _fused_kernel,
        grid=(b,),
        in_specs=[
            # only the 8 lighting channels of each batch row are DMA'd
            pl.BlockSpec((1, NC_SLAB, hw), lambda i: (i, 0, 0)),
            pl.BlockSpec((1, NC_SLAB, hw), lambda i: (i, 0, 0)),
            # small weight slab stays resident across the grid
            pl.BlockSpec((SLAB_ROWS, SLAB_COLS), lambda i: (0, 0)),
        ],
        out_specs=(
            # aliased into innerFeat: write back only the replaced 8 channels
            pl.BlockSpec((1, NC_SLAB, hw), lambda i: (i, 0, 0)),
            pl.BlockSpec((1, 2, NUM_SMALL), lambda i: (i, 0, 0)),
        ),
        out_shape=(
            jax.ShapeDtypeStruct((b, c, hw), jnp.float32),
            jax.ShapeDtypeStruct((b, 2, NUM_SMALL), jnp.float32),
        ),
        input_output_aliases={0: 0},
        compiler_params=pltpu.CompilerParams(
            dimension_semantics=("parallel",)),
    )(inner_flat, guide_flat, w_slab)

    light = packed[:, 0, 0:numDir]
    glight = packed[:, 1, 0:numDir]
    tmp = packed[:, 0, numDir:NUM_SMALL]
    gtmp = packed[:, 1, numDir:NUM_SMALL]
    return out_flat.reshape(b, c, row, col), light, glight, tmp, gtmp


# ---------------- pure-JAX reference (for verification) ---------------------
def _ref_forward(innerFeat, guide_feat, p):
    def prelu(x, a):
        return jnp.where(x >= 0, x, a * x)

    def fc(x, w):
        return x @ w.T

    a_d, a_t, a_pd, a_pt = p["prelu"]
    b, c, h, w = innerFeat.shape
    feat = innerFeat[:, :ncDir].mean(axis=(2, 3))
    gfeat = guide_feat[:, :ncDir].mean(axis=(2, 3))
    light = fc(prelu(fc(feat, p["wd1"]), a_d), p["wd2"])
    glight = fc(prelu(fc(gfeat, p["wd1"]), a_d), p["wd2"])
    featt = innerFeat[:, ncDir:ncDir + ncTmp].mean(axis=(2, 3))
    gfeatt = guide_feat[:, ncDir:ncDir + ncTmp].mean(axis=(2, 3))
    tmp = fc(prelu(fc(featt, p["wt1"]), a_t), p["wt2"])
    gtmp = fc(prelu(fc(gfeatt, p["wt1"]), a_t), p["wt2"])
    up_dir = jnp.maximum(fc(prelu(fc(glight, p["wpd1"]), a_pd), p["wpd2"]), 0.0)
    up_tmp = jnp.maximum(fc(prelu(fc(gtmp, p["wpt1"]), a_pt), p["wpt2"]), 0.0)
    out = innerFeat
    out = out.at[:, :ncDir].set(jnp.broadcast_to(up_dir[:, :, None, None], (b, ncDir, h, w)))
    out = out.at[:, ncDir:ncDir + ncTmp].set(
        jnp.broadcast_to(up_tmp[:, :, None, None], (b, ncTmp, h, w)))
    return out, light, glight, tmp, gtmp


if __name__ == "__main__":
    key = jax.random.PRNGKey(0)
    ks = jax.random.split(key, 12)

    params = {
        # 1x1 conv weights stored as (out_channels, in_channels), bias=False
        "wd1": 0.1 * jax.random.normal(ks[0], (ncMiddle, ncDir), jnp.float32),
        "wd2": 0.1 * jax.random.normal(ks[1], (numDir, ncMiddle), jnp.float32),
        "wt1": 0.1 * jax.random.normal(ks[2], (ncMiddle, ncTmp), jnp.float32),
        "wt2": 0.1 * jax.random.normal(ks[3], (numTmp, ncMiddle), jnp.float32),
        "wpd1": 0.1 * jax.random.normal(ks[4], (ncMiddle, numDir), jnp.float32),
        "wpd2": 0.1 * jax.random.normal(ks[5], (ncDir, ncMiddle), jnp.float32),
        "wpt1": 0.1 * jax.random.normal(ks[6], (ncMiddle, numTmp), jnp.float32),
        "wpt2": 0.1 * jax.random.normal(ks[7], (ncTmp, ncMiddle), jnp.float32),
        # nn.PReLU() default: single shared parameter, init 0.25
        # order: predict_dir_relu1, predict_tmp_relu1, post_dir_relu1, post_tmp_relu1
        "prelu": jnp.full((4,), 0.25, jnp.float32),
    }

    innerFeat = jax.random.normal(ks[8], (B, C, H, W), jnp.float32)
    guide_feat = jax.random.normal(ks[9], (B, C, H, W), jnp.float32)

    w_slab = jax.block_until_ready(pack_params(params))   # done once, outside forward

    # Reference is computed BEFORE the kernel call: innerFeat is donated
    # (invalidated) by lighting_net_forward.
    refs = jax.block_until_ready(_ref_forward(innerFeat, guide_feat, params))

    outs = jax.block_until_ready(lighting_net_forward(innerFeat, guide_feat, w_slab))

    for o, r in zip(outs, refs):
        assert o.shape == r.shape, (o.shape, r.shape)
        assert jnp.allclose(o, r, atol=1e-5, rtol=1e-5), float(jnp.abs(o - r).max())

    print("KERNEL_OK")
</pallas_src>

<mosaic_0001>
module attributes {stable_mosaic.version = 11 : i64} {
  func.func @_fused_kernel(%arg0: i32, %arg1: memref<1x8x256xf32, #tpu.memory_space<vmem>>, %arg2: memref<1x8x256xf32, #tpu.memory_space<vmem>>, %arg3: memref<88x32xf32, #tpu.memory_space<vmem>>, %arg4: memref<1x8x256xf32, #tpu.memory_space<vmem>>, %arg5: memref<1x2x14xf32, #tpu.memory_space<vmem>>) attributes {dimension_semantics = [#tpu.dimension_semantics<parallel>], iteration_bounds = array<i64: 2>, scalar_prefetch = 0 : i64, scratch_operands = 0 : i64, tpu.core_type = #tpu.core_type<tc>, window_params = [{transform_indices = @transform_0, window_bounds = array<i64: 1, 8, 256>}, {transform_indices = @transform_1, window_bounds = array<i64: 1, 8, 256>}, {pipeline_mode = #tpu.pipeline_mode<synchronous>, transform_indices = @transform_2, window_bounds = array<i64: 88, 32>}, {transform_indices = @transform_3, window_bounds = array<i64: 1, 8, 256>}, {transform_indices = @transform_4, window_bounds = array<i64: 1, 2, 14>}]} {
    %c0 = arith.constant 0 : index
    %c0_0 = arith.constant 0 : index
    %c0_1 = arith.constant 0 : index
    %0 = vector.load %arg1[%c0, %c0_0, %c0_1] : memref<1x8x256xf32, #tpu.memory_space<vmem>>, vector<1x8x256xf32>
    %cst = arith.constant dense<0.000000e+00> : vector<1x8xf32>
    %1 = vector.multi_reduction <add>, %0, %cst [2] : vector<1x8x256xf32> to vector<1x8xf32>
    %cst_2 = arith.constant 2.560000e+02 : f32
    %2 = vector.broadcast %cst_2 : f32 to vector<1x8xf32>
    %3 = arith.divf %1, %2 : vector<1x8xf32>
    %c0_3 = arith.constant 0 : index
    %c0_4 = arith.constant 0 : index
    %c0_5 = arith.constant 0 : index
    %4 = vector.load %arg2[%c0_3, %c0_4, %c0_5] : memref<1x8x256xf32, #tpu.memory_space<vmem>>, vector<1x8x256xf32>
    %cst_6 = arith.constant dense<0.000000e+00> : vector<1x8xf32>
    %5 = vector.multi_reduction <add>, %4, %cst_6 [2] : vector<1x8x256xf32> to vector<1x8xf32>
    %cst_7 = arith.constant 2.560000e+02 : f32
    %6 = vector.broadcast %cst_7 : f32 to vector<1x8xf32>
    %7 = arith.divf %5, %6 : vector<1x8xf32>
    %8 = tpu.concatenate %3, %7 in 0 : vector<1x8xf32>, vector<1x8xf32> -> vector<2x8xf32>
    %c0_8 = arith.constant 0 : index
    %c0_9 = arith.constant 0 : index
    %9 = vector.load %arg3[%c0_8, %c0_9] : memref<88x32xf32, #tpu.memory_space<vmem>>, vector<8x32xf32>
    %c8 = arith.constant 8 : index
    %c0_10 = arith.constant 0 : index
    %10 = vector.load %arg3[%c8, %c0_10] : memref<88x32xf32, #tpu.memory_space<vmem>>, vector<32x14xf32>
    %c40 = arith.constant 40 : index
    %c0_11 = arith.constant 0 : index
    %11 = vector.load %arg3[%c40, %c0_11] : memref<88x32xf32, #tpu.memory_space<vmem>>, vector<14x32xf32>
    %c54 = arith.constant 54 : index
    %c0_12 = arith.constant 0 : index
    %12 = vector.load %arg3[%c54, %c0_12] : memref<88x32xf32, #tpu.memory_space<vmem>>, vector<1x32xf32>
    %c55 = arith.constant 55 : index
    %c0_13 = arith.constant 0 : index
    %13 = vector.load %arg3[%c55, %c0_13] : memref<88x32xf32, #tpu.memory_space<vmem>>, vector<1x32xf32>
    %c56 = arith.constant 56 : index
    %c0_14 = arith.constant 0 : index
    %14 = vector.load %arg3[%c56, %c0_14] : memref<88x32xf32, #tpu.memory_space<vmem>>, vector<32x8xf32>
    %cst_15 = arith.constant dense<0.000000e+00> : vector<2x32xf32>
    %15 = tpu.matmul %8, %9, %cst_15 {dimension_numbers = #tpu.dot_dimension_numbers<[1], [0], [0], [1], [0, 0, 1, 1], [], []>} : vector<2x8xf32>, vector<8x32xf32>, vector<2x32xf32> -> vector<2x32xf32>
    %cst_16 = arith.constant 0.000000e+00 : f32
    %16 = vector.broadcast %cst_16 : f32 to vector<2x32xf32>
    %17 = arith.cmpf oge, %15, %16 : vector<2x32xf32>
    %18 = vector.broadcast %12 : vector<1x32xf32> to vector<2x32xf32>
    %19 = arith.mulf %18, %15 : vector<2x32xf32>
    %20 = arith.select %17, %15, %19 : vector<2x32xi1>, vector<2x32xf32>
    %cst_17 = arith.constant dense<0.000000e+00> : vector<2x14xf32>
    %21 = tpu.matmul %20, %10, %cst_17 {dimension_numbers = #tpu.dot_dimension_numbers<[1], [0], [0], [1], [0, 0, 1, 1], [], []>} : vector<2x32xf32>, vector<32x14xf32>, vector<2x14xf32> -> vector<2x14xf32>
    %22 = vector.extract_strided_slice %21 {offsets = [1, 0], sizes = [1, 14], strides = [1, 1]} : vector<2x14xf32> to vector<1x14xf32>
    %cst_18 = arith.constant dense<0.000000e+00> : vector<1x32xf32>
    %23 = tpu.matmul %22, %11, %cst_18 {dimension_numbers = #tpu.dot_dimension_numbers<[1], [0], [0], [1], [0, 0, 1, 1], [], []>} : vector<1x14xf32>, vector<14x32xf32>, vector<1x32xf32> -> vector<1x32xf32>
    %cst_19 = arith.constant 0.000000e+00 : f32
    %24 = vector.broadcast %cst_19 : f32 to vector<1x32xf32>
    %25 = arith.cmpf oge, %23, %24 : vector<1x32xf32>
    %26 = arith.mulf %13, %23 : vector<1x32xf32>
    %27 = arith.select %25, %23, %26 : vector<1x32xi1>, vector<1x32xf32>
    %cst_20 = arith.constant dense<0.000000e+00> : vector<1x8xf32>
    %28 = tpu.matmul %27, %14, %cst_20 {dimension_numbers = #tpu.dot_dimension_numbers<[1], [0], [0], [1], [0, 0, 1, 1], [], []>} : vector<1x32xf32>, vector<32x8xf32>, vector<1x8xf32> -> vector<1x8xf32>
    %cst_21 = arith.constant 0.000000e+00 : f32
    %29 = vector.broadcast %cst_21 : f32 to vector<1x8xf32>
    %30 = arith.maximumf %28, %29 : vector<1x8xf32>
    %31 = vector.shape_cast %21 : vector<2x14xf32> to vector<1x2x14xf32>
    %c0_22 = arith.constant 0 : index
    %c0_23 = arith.constant 0 : index
    %c0_24 = arith.constant 0 : index
    %32 = vector.load %arg5[%c0_22, %c0_23, %c0_24] : memref<1x2x14xf32, #tpu.memory_space<vmem>>, vector<1x2x14xf32>
    tpu.vector_store %arg5[%c0_22, %c0_23, %c0_24], %31 {strides = array<i32>} : memref<1x2x14xf32, #tpu.memory_space<vmem>>, vector<1x2x14xf32>,
    %33 = vector.shape_cast %30 : vector<1x8xf32> to vector<1x8x1xf32>
    %34 = vector.shape_cast %33 : vector<1x8x1xf32> to vector<1x8x1xf32>
    %35 = vector.broadcast %34 : vector<1x8x1xf32> to vector<1x8x256xf32>
    %c0_25 = arith.constant 0 : index
    %c0_26 = arith.constant 0 : index
    %c0_27 = arith.constant 0 : index
    %36 = vector.load %arg4[%c0_25, %c0_26, %c0_27] : memref<1x8x256xf32, #tpu.memory_space<vmem>>, vector<1x8x256xf32>
    tpu.vector_store %arg4[%c0_25, %c0_26, %c0_27], %35 {strides = array<i32>} : memref<1x8x256xf32, #tpu.memory_space<vmem>>, vector<1x8x256xf32>,
    return
  }
  func.func @transform_0(%arg0: i32) -> (i32, i32, i32) {
    %c0_i32 = arith.constant 0 : i32
    %c0_i32_0 = arith.constant 0 : i32
    %c0_i32_1 = arith.constant 0 : i32
    return %arg0, %c0_i32, %c0_i32_0 : i32, i32, i32
  }
  func.func @transform_1(%arg0: i32) -> (i32, i32, i32) {
    %c0_i32 = arith.constant 0 : i32
    %c0_i32_0 = arith.constant 0 : i32
    %c0_i32_1 = arith.constant 0 : i32
    return %arg0, %c0_i32, %c0_i32_0 : i32, i32, i32
  }
  func.func @transform_2(%arg0: i32) -> (i32, i32) {
    %c0_i32 = arith.constant 0 : i32
    %c0_i32_0 = arith.constant 0 : i32
    %c0_i32_1 = arith.constant 0 : i32
    return %c0_i32, %c0_i32_0 : i32, i32
  }
  func.func @transform_3(%arg0: i32) -> (i32, i32, i32) {
    %c0_i32 = arith.constant 0 : i32
    %c0_i32_0 = arith.constant 0 : i32
    %c0_i32_1 = arith.constant 0 : i32
    return %arg0, %c0_i32, %c0_i32_0 : i32, i32, i32
  }
  func.func @transform_4(%arg0: i32) -> (i32, i32, i32) {
    %c0_i32 = arith.constant 0 : i32
    %c0_i32_0 = arith.constant 0 : i32
    %c0_i32_1 = arith.constant 0 : i32
    return %arg0, %c0_i32, %c0_i32_0 : i32, i32, i32
  }
}

</mosaic_0001>

<bundles_post_ra>
// kernel: lighting_net_forward.1
= control target key start
LH: loop header
LB: loop body
LE: loop exit
PB: predicated region body
PF: predicated region fallthrough
CT: control target
= control target key end

     0   :  { %s828_s15 = smov 0   ;;  %s909_s0 = inlined_call_operand.vmem [shape: f32[2,12,256], index: 0, kind: input, shape index: {}, may-alias: {0,3}]   ;;  %s910_s1 = inlined_call_operand.vmem [shape: f32[2,12,256], index: 1, kind: input, shape index: {}]   ;;  %s911_s2 = inlined_call_operand.vmem [shape: f32[88,32], index: 2, kind: input, shape index: {}]   ;;  %s912_s3 = inlined_call_operand.vmem [shape: f32[2,12,256], index: 3, kind: output, shape index: {0}, may-alias: {0,3}]   ;;  %s913_s4 = inlined_call_operand.vmem [shape: f32[2,2,14], index: 4, kind: output, shape index: {1}]  }
   0x1 LB: > { %s691_s16 = sadd.s32 4294967295, %s797_s15   ;;  %p695_p0 = scmp.ge.s32.totalorder %s797_s15, 1  ;;  %s797_s15 = sphi %s828_s15, %s15_s15  }
   0x2   : > { %p175_p1 = scmp.lt.s32.totalorder %s797_s15, 3 }
   0x4   : > { %p176_p2 = pnand %p695_p0, %p175_p1 }
   0x5   : > { %p210_p3 = scmp.lt.s32.totalorder (!%p176_p2), %s691_s16, 1  ;;  %v258_v6 = vld [vmem:[%s911_s2] sm:$0xff] (!%p176_p2)  ;;  %v799_v7 = vmov (!%p176_p2), 0.0   ;;  %vm800_vm0 = vmmov (!%p176_p2), 0   ;;  %v801_v8 = vmov (!%p176_p2), 0.0|0.0   ;;  %v243_v9 = vlaneseq (!%p176_p2)  ;;  %v259_v16 = vld [vmem:[%s911_s2 + $0x8] sm:$0xff] (!%p176_p2) }
   0x6   : > { %179 = sbr.rel (%p176_p2) target bundleno = 1146 (0x47a), region = 32  ;;  %729 = vmatprep.subr.mxu1 (!%p176_p2), %v799_v7  ;;  %731 = vmatprep.mubr.msk.f32.mxu1 (!%p176_p2), %vm800_vm0, %v799_v7  ;;  %v260_v17 = vld [vmem:[%s911_s2 + $0x10] sm:$0xff] (!%p176_p2)  ;;  %vm256_vm1 = vcmask (!%p176_p2), 1040384   ;;  %vm271_vm2 = vcmask (!%p176_p2), 64512   ;;  %v261_v23 = vld [vmem:[%s911_s2 + $0x18] sm:$0xff] (!%p176_p2)  ;;  %v262_v24 = vld [vmem:[%s911_s2 + $0x20] sm:$0xff] (!%p176_p2) }
   0x7   : > { %730 = vmatpush3.msra.mxu1 (!%p176_p2), %v258_v6  ;;  %749 = vmatprep.mubr.msk.f32.mxu0 (!%p176_p2), %vm800_vm0, %v799_v7  ;;  %v244_v10 = vand.u32 (!%p176_p2), 127, %v243_v9  ;;  %v854_v11 = vshrl.u32 (!%p176_p2), %v243_v9, 7  ;;  %v764_v21 = vpack.c.bf16 (!%p176_p2), %v260_v17, %v259_v16  ;;  %v767_v25 = vpack.c.bf16 (!%p176_p2), %v262_v24, %v261_v23  ;;  %v704_v26 = vld [vmem:[%s911_s2 + $0x36] ss:$0 sm:$0xff] (!%p176_p2)  ;;  %v263_v31 = vld [vmem:[%s911_s2 + $0x28] sm:$0xff] (!%p176_p2)  ;;  %v267_v34 = vld [vmem:[%s911_s2 + $0x38] sm:$0xff] (!%p176_p2) }
   0x8   : > { %763 = vmatprep.subr.bf16.mxu1 (!%p176_p2), %v801_v8  ;;  %769 = vmatprep.subr.bf16.mxu0 (!%p176_p2), %v801_v8  ;;  %vm352_vm4 = vcmask (!%p176_p2), 261120   ;;  %v264_v32 = vld [vmem:[%s911_s2 + $0x30] sm:$0x3f] (!%p176_p2)  ;;  %vm431_vm5 = vcmask (!%p176_p2), 1045504   ;;  %vm802_vm6 = vmmov (!%p176_p2), 1   ;;  %v268_v35 = vld [vmem:[%s911_s2 + $0x40] sm:$0xff] (!%p176_p2) }
   0x9   : > { %v247_v13 = vsub.s32 (!%p176_p2), %v244_v10, %v854_v11  ;;  %v770_v33 = vpack.c.bf16 (!%p176_p2), %v264_v32, %v263_v31  ;;  %vm771_vm7 = vmpackc.low (!%p176_p2), %vm431_vm5, %vm802_vm6  ;;  %vm582_vm8 = vcmask (!%p176_p2), 107520   ;;  %vm428_vm9 = vcmask (!%p176_p2), 113664   ;;  %v269_v40 = vld [vmem:[%s911_s2 + $0x48] sm:$0xff] (!%p176_p2)  ;;  %v270_v41 = vld [vmem:[%s911_s2 + $0x50] sm:$0xff] (!%p176_p2) }
   0xa   : > { %v774_v37 = vpack.c.bf16 (!%p176_p2), %v268_v35, %v267_v34  ;;  %v777_v42 = vpack.c.bf16 (!%p176_p2), %v270_v41, %v269_v40  ;;  %v266_v43 = vld [vmem:[%s911_s2 + $0x37] sm:$0x1] (!%p176_p2)  ;;  %v586_v48 = vsub.s32 (!%p176_p2), 0, %v854_v11 }
   0xb   : > { %772 = vmatpush3.bf16.msk.msra.mxu0 (!%p176_p2), %vm771_vm7, %v770_v33 }
   0xc   : > { %773 = vmatprep.subr.bf16.mxu0 (!%p176_p2), %v801_v8 }
   0xd   : > { %s915_s16 = smov (!%p210_p3, %s691_s16), 1 }
   0xe   : > { %s839_s17 = sshll.u32 %s915_s16, 5  ;;  %s702_s14 = sshll.u32 %s915_s16, 1 }
   0xf   : > { %s214_s20 = scalar_lea.vmem %s909_s0, %s839_s17  ;;  %s219_s23 = scalar_lea.vmem %s910_s1, %s839_s17 }
  0x10   : > { %v229_v0 = vld [vmem:[%s214_s20] sm:$0xff]  ;;  %v230_v1 = vld [vmem:[%s214_s20 + $0x8] sm:$0xff]  ;;  %s228_s24 = scalar_lea.vmem %s913_s4, %s702_s14  ;;  %s224_s6 = scalar_lea.vmem %s912_s3, %s839_s17 }
  0x11   : > { %v236_v2 = vld [vmem:[%s219_s23] sm:$0xff]  ;;  %v231_v3 = vadd.f32 %v230_v1, %v229_v0  ;;  %v237_v4 = vld [vmem:[%s219_s23 + $0x8] sm:$0xff] }
  0x12   : > { %v238_v5 = vadd.f32 %v237_v4, %v236_v2 }
  0x13   : > { %232 = vadd.xlane.f32.xlu0 %v231_v3 }
  0x17   : > { %239 = vadd.xlane.f32.xlu0 %v238_v5 }
  0xa0   : > { %v233_v12 = vpop.xlane.xlu0 %232 }
  0xa1   : > { %v235_v14 = vmul.f32 0.00390625, %v233_v12 }
  0xa3   : > { %v248_v19 = vrot.slane %v235_v14, %v247_v13 }
  0xa4   : > { %v240_v15 = vpop.xlane.xlu0 %239 }
  0xa5   : > { %v241_v18 = vmul.f32 0.00390625, %v240_v15 }
  0xa7   : > { %v254_v20 = vrot.slane %v241_v18, %v247_v13 }
  0xa9   : > { %v257_v22 = vsel %vm256_vm1, %v248_v19, %v254_v20 }
  0xaa   : > { %732 = vmatmul.mubr.msk.f32.vlgmr.msra.gmra.mrb[0].mxu1 %vm271_vm2, %v257_v22 }
  0xab   : > { %765 = vmatpush3.bf16.msra.mxu1 %v764_v21  ;;  %742 = vmatprep.mubr.msk.f32.mxu1 %vm800_vm0, %v799_v7 }
  0xac   : > { %766 = vmatprep.subr.bf16.mxu1 %v801_v8 }
  0xaf   : > { %768 = vmatpush3.bf16.msra.mxu1 %v767_v25 }
 0x17d   : > { %v341_v27 = vpop.f32.mrb[0].mxu1 }
 0x17e   : > { %vm345_vm3 = vcmp.ge.f32.partialorder %v341_v27, 0.0  ;;  %v350_v28 = vmul.f32 %v704_v26, %v341_v27  ;;  %v733_v29 = vpop.f32.mrb[1].mxu1 }
 0x180   : > { %v351_v30 = vsel %vm345_vm3, %v341_v27, %v350_v28 }
 0x181   : > { %743 = vmatmul.mubr.msk.f32.vlgmr.msra.gmra.mrb[2].mxu1 %vm352_vm4, %v351_v30 }
 0x254   : > { %v422_v36 = vpop.f32.mrb[2].mxu1 }
 0x255   : > { %v427_v38 = vrot.slane %v422_v36, 1  ;;  %583 = vst.msk [vmem:[%s228_s24] sm:$0x3] %vm582_vm8, %v422_v36  ;;  %v744_v39 = vpop.f32.mrb[3].mxu1 }
 0x257   : > { %750 = vmatmul.mubr.msk.f32.vlgmr.msra.gmra.mrb[0].mxu0 %vm428_vm9, %v427_v38 }
 0x258   : > { %775 = vmatpush3.bf16.msra.mxu0 %v774_v37  ;;  %760 = vmatprep.mubr.msk.f32.mxu0 %vm800_vm0, %v799_v7 }
 0x259   : > { %776 = vmatprep.subr.bf16.mxu0 %v801_v8 }
 0x25c   : > { %778 = vmatpush3.bf16.msra.mxu0 %v777_v42 }
 0x32a   : > { %v501_v44 = vpop.f32.mrb[0].mxu0 }
 0x32b   : > { %vm505_vm10 = vcmp.ge.f32.partialorder %v501_v44, 0.0  ;;  %v506_v45 = vmul.f32 %v501_v44, %v266_v43  ;;  %v751_v46 = vpop.f32.mrb[1].mxu0 }
 0x32d   : > { %v507_v47 = vsel %vm505_vm10, %v501_v44, %v506_v45 }
 0x32e   : > { %761 = vmatmul.mubr.msk.f32.vlgmr.msra.gmra.mrb[2].mxu0 %vm352_vm4, %v507_v47 }
 0x401   : > { %v577_v49 = vpop.f32.mrb[2].mxu0 }
 0x402   : > { %v581_v50 = vmax.f32 %v577_v49, 0.0  ;;  %v762_v51 = vpop.f32.mrb[3].mxu0 }
 0x404   : > { %v587_v52 = vrot.slane %v581_v50, %v586_v48 }
 0x406   : > { %589 = vbcast.lane.b32.xlu1 %v587_v52, 256 }
 0x478   : > { %v590_v53 = vpop.permute.xlu1 %589 }
 0x479   : > { %591 = vst [vmem:[%s224_s6] sm:$0xff] %v590_v53  ;;  %592 = vst [vmem:[%s224_s6 + $0x8] sm:$0xff] %v590_v53 }
 0x47a PF: > { %s15_s15 = sadd.s32 1, %s797_s15  }
 0x47b   : > { %p12_p4 = scmp.ge.s32.totalorder %s15_s15, 4  }
 0x47d   :  { %14 = sbr.rel (!%p12_p4) target bundleno = 1 (0x1), region = 77 }

</bundles_post_ra>
